<compile_context>
chip_gen: v6e
topology: v6e:2x2x1
jax: 0.10.0
libtpu: 0.0.40
codegen_flags: <defaults>
</compile_context>

<pallas_src>
import jax
import jax.numpy as jnp
from jax.experimental import pallas as pl
from jax.experimental.pallas import tpu as pltpu


def _grid_attention_kernel(x_ref, g_ref, mh_ref, mw_ref,
                           wt_ref, wp_ref, btp_ref, wpsi_ref, bpsi_ref,
                           o_ref):
    # x_ref : (1, C, TILE_H, Wx)   activation tile (compute dtype)
    # g_ref : (1, C, Hg, Wg)       full gating signal for this batch element
    # mh_ref: (TILE_H, Hg)         H-interp rows for this spatial tile
    # mw_ref: (Wg, Wx)             transposed W-interp matrix
    # wt/wp : (C, C) f32 SMEM      theta / phi 1x1-conv weights (Cout, Cin)
    # btp   : (C,)  f32 SMEM       b_theta + b_phi
    # wpsi  : (C,)  f32 SMEM       psi 1x1-conv weights
    # bpsi  : (1,)  f32 SMEM       psi bias
    C = x_ref.shape[1]
    tile_h = x_ref.shape[2]
    wx = x_ref.shape[3]

    x_all = x_ref[0]          # (C, TILE_H, Wx)
    g_all = g_ref[0]          # (C, Hg, Wg)
    mh = mh_ref[...]          # (TILE_H, Hg)
    mw = mw_ref[...]          # (Wg, Wx)

    # Separable bilinear upsample (align_corners=True) of g, per channel:
    #   g_up_c = Mh_tile @ g_c @ Mw^T   -- two small MXU matmuls, f32 accumulate.
    xs, g_up = [], []
    for c in range(C):
        q = jnp.dot(mh, g_all[c], preferred_element_type=jnp.float32)
        q = q.astype(mw.dtype)
        g_up.append(jnp.dot(q, mw, preferred_element_type=jnp.float32))  # (TILE_H, Wx) f32
        xs.append(x_all[c].astype(jnp.float32))

    # Fused theta/phi 1x1 convs + relu + psi 1x1 conv + sigmoid on the VPU,
    # with scalar weights read from SMEM (channel counts are tiny).
    psi = jnp.full((tile_h, wx), bpsi_ref[0], jnp.float32)
    for o in range(C):
        z = jnp.full((tile_h, wx), btp_ref[o], jnp.float32)      # b_theta[o] + b_phi[o]
        for ci in range(C):
            z = z + wt_ref[o, ci] * xs[ci] + wp_ref[o, ci] * g_up[ci]
        psi = psi + wpsi_ref[o] * jnp.maximum(z, 0.0)            # relu, then psi weight
    o_ref[0] = jax.nn.sigmoid(psi).astype(o_ref.dtype)


def _interp_matrix_1d(out_size, in_size):
    """1-D linear interpolation matrix matching
    F.interpolate(mode='bilinear', align_corners=True) along one axis."""
    if in_size == 1:
        return jnp.ones((out_size, 1), jnp.float32)
    if out_size == 1:
        return jnp.zeros((1, in_size), jnp.float32).at[0, 0].set(1.0)
    src = jnp.arange(out_size, dtype=jnp.float32) * (in_size - 1) / (out_size - 1)
    i0 = jnp.clip(jnp.floor(src).astype(jnp.int32), 0, in_size - 2)
    frac = src - i0.astype(jnp.float32)
    rows = jnp.arange(out_size)
    m = jnp.zeros((out_size, in_size), jnp.float32)
    m = m.at[rows, i0].add(1.0 - frac)
    m = m.at[rows, i0 + 1].add(frac)
    return m


def grid_attention_block(x_nchw, g_nchw, params,
                         compute_dtype=jnp.bfloat16, tile_h=None):
    """Pallas implementation of GridAttentionBlock.forward.

    x_nchw: (N, C, Hx, Wx), g_nchw: (N, C, Hg, Wg) -> output (N, 1, Hx, Wx)."""
    N, C, Hx, Wx = x_nchw.shape
    Ng, Cg, Hg, Wg = g_nchw.shape
    assert N == Ng and C == Cg

    if tile_h is None:
        tile_h = 8 if Hx % 8 == 0 else Hx      # keep the sublane dim 8-aligned
    assert Hx % tile_h == 0
    n_t = Hx // tile_h

    cdt = compute_dtype
    xk = x_nchw.astype(cdt)    # ideally the caller already supplies this dtype
    gk = g_nchw.astype(cdt)

    # Separable interpolation operands (tiny): rows of mh are tiled with the grid.
    mh = _interp_matrix_1d(Hx, Hg).astype(cdt)        # (Hx, Hg)
    mwT = _interp_matrix_1d(Wx, Wg).T.astype(cdt)     # (Wg, Wx)

    # 1x1-conv parameters as SMEM scalars (f32 throughout).
    wt = params["w_theta"].astype(jnp.float32)                         # (C, C)
    wp = params["w_phi"].astype(jnp.float32)                           # (C, C)
    btp = (params["b_theta"] + params["b_phi"]).astype(jnp.float32)    # (C,)
    wpsi = params["w_psi"].astype(jnp.float32)                         # (C,)
    bpsi = params["b_psi"].reshape((1,)).astype(jnp.float32)           # (1,)

    smem_specs = [pl.BlockSpec(memory_space=pltpu.MemorySpace.SMEM) for _ in range(5)]

    out = pl.pallas_call(
        _grid_attention_kernel,
        out_shape=jax.ShapeDtypeStruct((N, Hx, Wx), jnp.float32),
        grid=(N, n_t),
        in_specs=[
            pl.BlockSpec((1, C, tile_h, Wx), lambda b, t: (b, 0, t, 0)),  # x tile
            pl.BlockSpec((1, C, Hg, Wg), lambda b, t: (b, 0, 0, 0)),      # g (whole, small)
            pl.BlockSpec((tile_h, Hg), lambda b, t: (t, 0)),              # H-interp rows
            pl.BlockSpec((Wg, Wx), lambda b, t: (0, 0)),                  # W-interp (resident)
        ] + smem_specs,
        out_specs=pl.BlockSpec((1, tile_h, Wx), lambda b, t: (b, t, 0)),
        compiler_params=pltpu.CompilerParams(
            dimension_semantics=("parallel", "parallel"),
            vmem_limit_bytes=32 * 1024 * 1024),
    )(xk, gk, mh, mwT, wt, wp, btp, wpsi, bpsi)

    # (N, Hx, Wx) -> NCHW (N, 1, Hx, Wx): free reshape, no transpose.
    return out.reshape(N, 1, Hx, Wx)


def _reference(x, g, params):
    """Pure-JAX f32 reference (same math as the PyTorch module)."""
    N, C, Hx, Wx = x.shape
    _, _, Hg, Wg = g.shape
    theta = (jnp.einsum("oc,nchw->nohw", params["w_theta"], x)
             + params["b_theta"][None, :, None, None])
    phi = (jnp.einsum("oc,nchw->nohw", params["w_phi"], g)
           + params["b_phi"][None, :, None, None])
    mh = _interp_matrix_1d(Hx, Hg)
    mw = _interp_matrix_1d(Wx, Wg)
    phi_up = jnp.einsum("uh,nchw,vw->ncuv", mh, phi, mw)
    f = jnp.maximum(theta + phi_up, 0.0)
    psi = jnp.einsum("c,nchw->nhw", params["w_psi"], f)[:, None] + params["b_psi"]
    return jax.nn.sigmoid(psi)


def init_params(key, in_channels):
    """Deterministic synthetic parameters (PyTorch 1x1-conv shapes, (Cout, Cin))."""
    C = in_channels
    ks = jax.random.split(key, 6)
    s = 0.2
    return {
        "w_theta": s * jax.random.normal(ks[0], (C, C), jnp.float32),
        "b_theta": s * jax.random.normal(ks[1], (C,), jnp.float32),
        "w_phi":   s * jax.random.normal(ks[2], (C, C), jnp.float32),
        "b_phi":   s * jax.random.normal(ks[3], (C,), jnp.float32),
        "w_psi":   s * jax.random.normal(ks[4], (C,), jnp.float32),   # Conv2d(C, 1, 1)
        "b_psi":   s * jax.random.normal(ks[5], (1,), jnp.float32),
    }


if __name__ == "__main__":
    key = jax.random.PRNGKey(0)
    kx, kg, kp = jax.random.split(key, 3)

    N, C = 2, 4
    Hx = Wx = 16      # x spatial size
    Hg = Wg = 8       # gating spatial size (upsampled to x's size in forward)

    x = jax.random.normal(kx, (N, C, Hx, Wx), jnp.float32)
    g = jax.random.normal(kg, (N, C, Hg, Wg), jnp.float32)
    params = init_params(kp, C)

    ref = jax.block_until_ready(_reference(x, g, params))

    # f32 run: tight check against the pure-JAX reference.
    out_f32 = jax.block_until_ready(
        grid_attention_block(x, g, params, compute_dtype=jnp.float32))
    assert out_f32.shape == (N, 1, Hx, Wx), out_f32.shape
    assert jnp.allclose(out_f32, ref, atol=2e-5, rtol=2e-5), "f32 mismatch vs reference"

    # bf16 run (halved HBM/VMEM traffic, f32 accumulation): looser tolerance.
    out_bf16 = jax.block_until_ready(
        grid_attention_block(x, g, params, compute_dtype=jnp.bfloat16))
    assert jnp.allclose(out_bf16, ref, atol=3e-2, rtol=3e-2), "bf16 mismatch vs reference"

    print("KERNEL_OK")
</pallas_src>

<mosaic_0001>
module attributes {stable_mosaic.version = 11 : i64} {
  func.func @_grid_attention_kernel(%arg0: i32, %arg1: i32, %arg2: memref<1x4x8x16xf32, #tpu.memory_space<vmem>>, %arg3: memref<1x4x8x8xf32, #tpu.memory_space<vmem>>, %arg4: memref<8x8xf32, #tpu.memory_space<vmem>>, %arg5: memref<8x16xf32, #tpu.memory_space<vmem>>, %arg6: memref<4x4xf32, #tpu.memory_space<smem>>, %arg7: memref<4x4xf32, #tpu.memory_space<smem>>, %arg8: memref<4xf32, #tpu.memory_space<smem>>, %arg9: memref<4xf32, #tpu.memory_space<smem>>, %arg10: memref<1xf32, #tpu.memory_space<smem>>, %arg11: memref<1x8x16xf32, #tpu.memory_space<vmem>>) attributes {dimension_semantics = [#tpu.dimension_semantics<parallel>, #tpu.dimension_semantics<parallel>], iteration_bounds = array<i64: 2, 2>, scalar_prefetch = 0 : i64, scratch_operands = 0 : i64, tpu.core_type = #tpu.core_type<tc>, window_params = [{transform_indices = @transform_0, window_bounds = array<i64: 1, 4, 8, 16>}, {transform_indices = @transform_1, window_bounds = array<i64: 1, 4, 8, 8>}, {transform_indices = @transform_2, window_bounds = array<i64: 8, 8>}, {pipeline_mode = #tpu.pipeline_mode<synchronous>, transform_indices = @transform_3, window_bounds = array<i64: 8, 16>}, {transform_indices = @transform_4, window_bounds = array<i64: 4, 4>}, {transform_indices = @transform_5, window_bounds = array<i64: 4, 4>}, {transform_indices = @transform_6, window_bounds = array<i64: 4>}, {transform_indices = @transform_7, window_bounds = array<i64: 4>}, {transform_indices = @transform_8, window_bounds = array<i64: 1>}, {transform_indices = @transform_9, window_bounds = array<i64: 1, 8, 16>}]} {
    %c0 = arith.constant 0 : index
    %c0_0 = arith.constant 0 : index
    %c0_1 = arith.constant 0 : index
    %c0_2 = arith.constant 0 : index
    %0 = vector.load %arg2[%c0, %c0_0, %c0_1, %c0_2] : memref<1x4x8x16xf32, #tpu.memory_space<vmem>>, vector<1x4x8x16xf32>
    %1 = vector.shape_cast %0 : vector<1x4x8x16xf32> to vector<4x8x16xf32>
    %c0_3 = arith.constant 0 : index
    %c0_4 = arith.constant 0 : index
    %c0_5 = arith.constant 0 : index
    %c0_6 = arith.constant 0 : index
    %2 = vector.load %arg3[%c0_3, %c0_4, %c0_5, %c0_6] : memref<1x4x8x8xf32, #tpu.memory_space<vmem>>, vector<1x4x8x8xf32>
    %3 = vector.shape_cast %2 : vector<1x4x8x8xf32> to vector<4x8x8xf32>
    %c0_7 = arith.constant 0 : index
    %c0_8 = arith.constant 0 : index
    %4 = vector.load %arg4[%c0_7, %c0_8] : memref<8x8xf32, #tpu.memory_space<vmem>>, vector<8x8xf32>
    %c0_9 = arith.constant 0 : index
    %c0_10 = arith.constant 0 : index
    %5 = vector.load %arg5[%c0_9, %c0_10] : memref<8x16xf32, #tpu.memory_space<vmem>>, vector<8x16xf32>
    %6 = vector.extract_strided_slice %3 {offsets = [0, 0, 0], sizes = [1, 8, 8], strides = [1, 1, 1]} : vector<4x8x8xf32> to vector<1x8x8xf32>
    %7 = vector.shape_cast %6 : vector<1x8x8xf32> to vector<8x8xf32>
    %cst = arith.constant dense<0.000000e+00> : vector<8x8xf32>
    %8 = tpu.matmul %4, %7, %cst {dimension_numbers = #tpu.dot_dimension_numbers<[1], [0], [0], [1], [0, 0, 1, 1], [], []>} : vector<8x8xf32>, vector<8x8xf32>, vector<8x8xf32> -> vector<8x8xf32>
    %cst_11 = arith.constant dense<0.000000e+00> : vector<8x16xf32>
    %9 = tpu.matmul %8, %5, %cst_11 {dimension_numbers = #tpu.dot_dimension_numbers<[1], [0], [0], [1], [0, 0, 1, 1], [], []>} : vector<8x8xf32>, vector<8x16xf32>, vector<8x16xf32> -> vector<8x16xf32>
    %10 = vector.extract_strided_slice %1 {offsets = [0, 0, 0], sizes = [1, 8, 16], strides = [1, 1, 1]} : vector<4x8x16xf32> to vector<1x8x16xf32>
    %11 = vector.shape_cast %10 : vector<1x8x16xf32> to vector<8x16xf32>
    %12 = vector.extract_strided_slice %3 {offsets = [1, 0, 0], sizes = [1, 8, 8], strides = [1, 1, 1]} : vector<4x8x8xf32> to vector<1x8x8xf32>
    %13 = vector.shape_cast %12 : vector<1x8x8xf32> to vector<8x8xf32>
    %cst_12 = arith.constant dense<0.000000e+00> : vector<8x8xf32>
    %14 = tpu.matmul %4, %13, %cst_12 {dimension_numbers = #tpu.dot_dimension_numbers<[1], [0], [0], [1], [0, 0, 1, 1], [], []>} : vector<8x8xf32>, vector<8x8xf32>, vector<8x8xf32> -> vector<8x8xf32>
    %cst_13 = arith.constant dense<0.000000e+00> : vector<8x16xf32>
    %15 = tpu.matmul %14, %5, %cst_13 {dimension_numbers = #tpu.dot_dimension_numbers<[1], [0], [0], [1], [0, 0, 1, 1], [], []>} : vector<8x8xf32>, vector<8x16xf32>, vector<8x16xf32> -> vector<8x16xf32>
    %16 = vector.extract_strided_slice %1 {offsets = [1, 0, 0], sizes = [1, 8, 16], strides = [1, 1, 1]} : vector<4x8x16xf32> to vector<1x8x16xf32>
    %17 = vector.shape_cast %16 : vector<1x8x16xf32> to vector<8x16xf32>
    %18 = vector.extract_strided_slice %3 {offsets = [2, 0, 0], sizes = [1, 8, 8], strides = [1, 1, 1]} : vector<4x8x8xf32> to vector<1x8x8xf32>
    %19 = vector.shape_cast %18 : vector<1x8x8xf32> to vector<8x8xf32>
    %cst_14 = arith.constant dense<0.000000e+00> : vector<8x8xf32>
    %20 = tpu.matmul %4, %19, %cst_14 {dimension_numbers = #tpu.dot_dimension_numbers<[1], [0], [0], [1], [0, 0, 1, 1], [], []>} : vector<8x8xf32>, vector<8x8xf32>, vector<8x8xf32> -> vector<8x8xf32>
    %cst_15 = arith.constant dense<0.000000e+00> : vector<8x16xf32>
    %21 = tpu.matmul %20, %5, %cst_15 {dimension_numbers = #tpu.dot_dimension_numbers<[1], [0], [0], [1], [0, 0, 1, 1], [], []>} : vector<8x8xf32>, vector<8x16xf32>, vector<8x16xf32> -> vector<8x16xf32>
    %22 = vector.extract_strided_slice %1 {offsets = [2, 0, 0], sizes = [1, 8, 16], strides = [1, 1, 1]} : vector<4x8x16xf32> to vector<1x8x16xf32>
    %23 = vector.shape_cast %22 : vector<1x8x16xf32> to vector<8x16xf32>
    %24 = vector.extract_strided_slice %3 {offsets = [3, 0, 0], sizes = [1, 8, 8], strides = [1, 1, 1]} : vector<4x8x8xf32> to vector<1x8x8xf32>
    %25 = vector.shape_cast %24 : vector<1x8x8xf32> to vector<8x8xf32>
    %cst_16 = arith.constant dense<0.000000e+00> : vector<8x8xf32>
    %26 = tpu.matmul %4, %25, %cst_16 {dimension_numbers = #tpu.dot_dimension_numbers<[1], [0], [0], [1], [0, 0, 1, 1], [], []>} : vector<8x8xf32>, vector<8x8xf32>, vector<8x8xf32> -> vector<8x8xf32>
    %cst_17 = arith.constant dense<0.000000e+00> : vector<8x16xf32>
    %27 = tpu.matmul %26, %5, %cst_17 {dimension_numbers = #tpu.dot_dimension_numbers<[1], [0], [0], [1], [0, 0, 1, 1], [], []>} : vector<8x8xf32>, vector<8x16xf32>, vector<8x16xf32> -> vector<8x16xf32>
    %28 = vector.extract_strided_slice %1 {offsets = [3, 0, 0], sizes = [1, 8, 16], strides = [1, 1, 1]} : vector<4x8x16xf32> to vector<1x8x16xf32>
    %29 = vector.shape_cast %28 : vector<1x8x16xf32> to vector<8x16xf32>
    %c0_18 = arith.constant 0 : index
    %30 = memref.load %arg10[%c0_18] : memref<1xf32, #tpu.memory_space<smem>>
    %31 = vector.broadcast %30 : f32 to vector<8x16xf32>
    %c0_19 = arith.constant 0 : index
    %32 = memref.load %arg8[%c0_19] : memref<4xf32, #tpu.memory_space<smem>>
    %33 = vector.broadcast %32 : f32 to vector<8x16xf32>
    %c0_20 = arith.constant 0 : index
    %c0_21 = arith.constant 0 : index
    %34 = memref.load %arg6[%c0_20, %c0_21] : memref<4x4xf32, #tpu.memory_space<smem>>
    %35 = vector.broadcast %34 : f32 to vector<8x16xf32>
    %36 = arith.mulf %35, %11 : vector<8x16xf32>
    %37 = arith.addf %33, %36 : vector<8x16xf32>
    %c0_22 = arith.constant 0 : index
    %c0_23 = arith.constant 0 : index
    %38 = memref.load %arg7[%c0_22, %c0_23] : memref<4x4xf32, #tpu.memory_space<smem>>
    %39 = vector.broadcast %38 : f32 to vector<8x16xf32>
    %40 = arith.mulf %39, %9 : vector<8x16xf32>
    %41 = arith.addf %37, %40 : vector<8x16xf32>
    %c0_24 = arith.constant 0 : index
    %c1 = arith.constant 1 : index
    %42 = memref.load %arg6[%c0_24, %c1] : memref<4x4xf32, #tpu.memory_space<smem>>
    %43 = vector.broadcast %42 : f32 to vector<8x16xf32>
    %44 = arith.mulf %43, %17 : vector<8x16xf32>
    %45 = arith.addf %41, %44 : vector<8x16xf32>
    %c0_25 = arith.constant 0 : index
    %c1_26 = arith.constant 1 : index
    %46 = memref.load %arg7[%c0_25, %c1_26] : memref<4x4xf32, #tpu.memory_space<smem>>
    %47 = vector.broadcast %46 : f32 to vector<8x16xf32>
    %48 = arith.mulf %47, %15 : vector<8x16xf32>
    %49 = arith.addf %45, %48 : vector<8x16xf32>
    %c0_27 = arith.constant 0 : index
    %c2 = arith.constant 2 : index
    %50 = memref.load %arg6[%c0_27, %c2] : memref<4x4xf32, #tpu.memory_space<smem>>
    %51 = vector.broadcast %50 : f32 to vector<8x16xf32>
    %52 = arith.mulf %51, %23 : vector<8x16xf32>
    %53 = arith.addf %49, %52 : vector<8x16xf32>
    %c0_28 = arith.constant 0 : index
    %c2_29 = arith.constant 2 : index
    %54 = memref.load %arg7[%c0_28, %c2_29] : memref<4x4xf32, #tpu.memory_space<smem>>
    %55 = vector.broadcast %54 : f32 to vector<8x16xf32>
    %56 = arith.mulf %55, %21 : vector<8x16xf32>
    %57 = arith.addf %53, %56 : vector<8x16xf32>
    %c0_30 = arith.constant 0 : index
    %c3 = arith.constant 3 : index
    %58 = memref.load %arg6[%c0_30, %c3] : memref<4x4xf32, #tpu.memory_space<smem>>
    %59 = vector.broadcast %58 : f32 to vector<8x16xf32>
    %60 = arith.mulf %59, %29 : vector<8x16xf32>
    %61 = arith.addf %57, %60 : vector<8x16xf32>
    %c0_31 = arith.constant 0 : index
    %c3_32 = arith.constant 3 : index
    %62 = memref.load %arg7[%c0_31, %c3_32] : memref<4x4xf32, #tpu.memory_space<smem>>
    %63 = vector.broadcast %62 : f32 to vector<8x16xf32>
    %64 = arith.mulf %63, %27 : vector<8x16xf32>
    %65 = arith.addf %61, %64 : vector<8x16xf32>
    %c0_33 = arith.constant 0 : index
    %66 = memref.load %arg9[%c0_33] : memref<4xf32, #tpu.memory_space<smem>>
    %cst_34 = arith.constant 0.000000e+00 : f32
    %67 = vector.broadcast %cst_34 : f32 to vector<8x16xf32>
    %68 = arith.maximumf %65, %67 : vector<8x16xf32>
    %69 = vector.broadcast %66 : f32 to vector<8x16xf32>
    %70 = arith.mulf %69, %68 : vector<8x16xf32>
    %71 = arith.addf %31, %70 : vector<8x16xf32>
    %c1_35 = arith.constant 1 : index
    %72 = memref.load %arg8[%c1_35] : memref<4xf32, #tpu.memory_space<smem>>
    %73 = vector.broadcast %72 : f32 to vector<8x16xf32>
    %c1_36 = arith.constant 1 : index
    %c0_37 = arith.constant 0 : index
    %74 = memref.load %arg6[%c1_36, %c0_37] : memref<4x4xf32, #tpu.memory_space<smem>>
    %75 = vector.broadcast %74 : f32 to vector<8x16xf32>
    %76 = arith.mulf %75, %11 : vector<8x16xf32>
    %77 = arith.addf %73, %76 : vector<8x16xf32>
    %c1_38 = arith.constant 1 : index
    %c0_39 = arith.constant 0 : index
    %78 = memref.load %arg7[%c1_38, %c0_39] : memref<4x4xf32, #tpu.memory_space<smem>>
    %79 = vector.broadcast %78 : f32 to vector<8x16xf32>
    %80 = arith.mulf %79, %9 : vector<8x16xf32>
    %81 = arith.addf %77, %80 : vector<8x16xf32>
    %c1_40 = arith.constant 1 : index
    %c1_41 = arith.constant 1 : index
    %82 = memref.load %arg6[%c1_40, %c1_41] : memref<4x4xf32, #tpu.memory_space<smem>>
    %83 = vector.broadcast %82 : f32 to vector<8x16xf32>
    %84 = arith.mulf %83, %17 : vector<8x16xf32>
    %85 = arith.addf %81, %84 : vector<8x16xf32>
    %c1_42 = arith.constant 1 : index
    %c1_43 = arith.constant 1 : index
    %86 = memref.load %arg7[%c1_42, %c1_43] : memref<4x4xf32, #tpu.memory_space<smem>>
    %87 = vector.broadcast %86 : f32 to vector<8x16xf32>
    %88 = arith.mulf %87, %15 : vector<8x16xf32>
    %89 = arith.addf %85, %88 : vector<8x16xf32>
    %c1_44 = arith.constant 1 : index
    %c2_45 = arith.constant 2 : index
    %90 = memref.load %arg6[%c1_44, %c2_45] : memref<4x4xf32, #tpu.memory_space<smem>>
    %91 = vector.broadcast %90 : f32 to vector<8x16xf32>
    %92 = arith.mulf %91, %23 : vector<8x16xf32>
    %93 = arith.addf %89, %92 : vector<8x16xf32>
    %c1_46 = arith.constant 1 : index
    %c2_47 = arith.constant 2 : index
    %94 = memref.load %arg7[%c1_46, %c2_47] : memref<4x4xf32, #tpu.memory_space<smem>>
    %95 = vector.broadcast %94 : f32 to vector<8x16xf32>
    %96 = arith.mulf %95, %21 : vector<8x16xf32>
    %97 = arith.addf %93, %96 : vector<8x16xf32>
    %c1_48 = arith.constant 1 : index
    %c3_49 = arith.constant 3 : index
    %98 = memref.load %arg6[%c1_48, %c3_49] : memref<4x4xf32, #tpu.memory_space<smem>>
    %99 = vector.broadcast %98 : f32 to vector<8x16xf32>
    %100 = arith.mulf %99, %29 : vector<8x16xf32>
    %101 = arith.addf %97, %100 : vector<8x16xf32>
    %c1_50 = arith.constant 1 : index
    %c3_51 = arith.constant 3 : index
    %102 = memref.load %arg7[%c1_50, %c3_51] : memref<4x4xf32, #tpu.memory_space<smem>>
    %103 = vector.broadcast %102 : f32 to vector<8x16xf32>
    %104 = arith.mulf %103, %27 : vector<8x16xf32>
    %105 = arith.addf %101, %104 : vector<8x16xf32>
    %c1_52 = arith.constant 1 : index
    %106 = memref.load %arg9[%c1_52] : memref<4xf32, #tpu.memory_space<smem>>
    %cst_53 = arith.constant 0.000000e+00 : f32
    %107 = vector.broadcast %cst_53 : f32 to vector<8x16xf32>
    %108 = arith.maximumf %105, %107 : vector<8x16xf32>
    %109 = vector.broadcast %106 : f32 to vector<8x16xf32>
    %110 = arith.mulf %109, %108 : vector<8x16xf32>
    %111 = arith.addf %71, %110 : vector<8x16xf32>
    %c2_54 = arith.constant 2 : index
    %112 = memref.load %arg8[%c2_54] : memref<4xf32, #tpu.memory_space<smem>>
    %113 = vector.broadcast %112 : f32 to vector<8x16xf32>
    %c2_55 = arith.constant 2 : index
    %c0_56 = arith.constant 0 : index
    %114 = memref.load %arg6[%c2_55, %c0_56] : memref<4x4xf32, #tpu.memory_space<smem>>
    %115 = vector.broadcast %114 : f32 to vector<8x16xf32>
    %116 = arith.mulf %115, %11 : vector<8x16xf32>
    %117 = arith.addf %113, %116 : vector<8x16xf32>
    %c2_57 = arith.constant 2 : index
    %c0_58 = arith.constant 0 : index
    %118 = memref.load %arg7[%c2_57, %c0_58] : memref<4x4xf32, #tpu.memory_space<smem>>
    %119 = vector.broadcast %118 : f32 to vector<8x16xf32>
    %120 = arith.mulf %119, %9 : vector<8x16xf32>
    %121 = arith.addf %117, %120 : vector<8x16xf32>
    %c2_59 = arith.constant 2 : index
    %c1_60 = arith.constant 1 : index
    %122 = memref.load %arg6[%c2_59, %c1_60] : memref<4x4xf32, #tpu.memory_space<smem>>
    %123 = vector.broadcast %122 : f32 to vector<8x16xf32>
    %124 = arith.mulf %123, %17 : vector<8x16xf32>
    %125 = arith.addf %121, %124 : vector<8x16xf32>
    %c2_61 = arith.constant 2 : index
    %c1_62 = arith.constant 1 : index
    %126 = memref.load %arg7[%c2_61, %c1_62] : memref<4x4xf32, #tpu.memory_space<smem>>
    %127 = vector.broadcast %126 : f32 to vector<8x16xf32>
    %128 = arith.mulf %127, %15 : vector<8x16xf32>
    %129 = arith.addf %125, %128 : vector<8x16xf32>
    %c2_63 = arith.constant 2 : index
    %c2_64 = arith.constant 2 : index
    %130 = memref.load %arg6[%c2_63, %c2_64] : memref<4x4xf32, #tpu.memory_space<smem>>
    %131 = vector.broadcast %130 : f32 to vector<8x16xf32>
    %132 = arith.mulf %131, %23 : vector<8x16xf32>
    %133 = arith.addf %129, %132 : vector<8x16xf32>
    %c2_65 = arith.constant 2 : index
    %c2_66 = arith.constant 2 : index
    %134 = memref.load %arg7[%c2_65, %c2_66] : memref<4x4xf32, #tpu.memory_space<smem>>
    %135 = vector.broadcast %134 : f32 to vector<8x16xf32>
    %136 = arith.mulf %135, %21 : vector<8x16xf32>
    %137 = arith.addf %133, %136 : vector<8x16xf32>
    %c2_67 = arith.constant 2 : index
    %c3_68 = arith.constant 3 : index
    %138 = memref.load %arg6[%c2_67, %c3_68] : memref<4x4xf32, #tpu.memory_space<smem>>
    %139 = vector.broadcast %138 : f32 to vector<8x16xf32>
    %140 = arith.mulf %139, %29 : vector<8x16xf32>
    %141 = arith.addf %137, %140 : vector<8x16xf32>
    %c2_69 = arith.constant 2 : index
    %c3_70 = arith.constant 3 : index
    %142 = memref.load %arg7[%c2_69, %c3_70] : memref<4x4xf32, #tpu.memory_space<smem>>
    %143 = vector.broadcast %142 : f32 to vector<8x16xf32>
    %144 = arith.mulf %143, %27 : vector<8x16xf32>
    %145 = arith.addf %141, %144 : vector<8x16xf32>
    %c2_71 = arith.constant 2 : index
    %146 = memref.load %arg9[%c2_71] : memref<4xf32, #tpu.memory_space<smem>>
    %cst_72 = arith.constant 0.000000e+00 : f32
    %147 = vector.broadcast %cst_72 : f32 to vector<8x16xf32>
    %148 = arith.maximumf %145, %147 : vector<8x16xf32>
    %149 = vector.broadcast %146 : f32 to vector<8x16xf32>
    %150 = arith.mulf %149, %148 : vector<8x16xf32>
    %151 = arith.addf %111, %150 : vector<8x16xf32>
    %c3_73 = arith.constant 3 : index
    %152 = memref.load %arg8[%c3_73] : memref<4xf32, #tpu.memory_space<smem>>
    %153 = vector.broadcast %152 : f32 to vector<8x16xf32>
    %c3_74 = arith.constant 3 : index
    %c0_75 = arith.constant 0 : index
    %154 = memref.load %arg6[%c3_74, %c0_75] : memref<4x4xf32, #tpu.memory_space<smem>>
    %155 = vector.broadcast %154 : f32 to vector<8x16xf32>
    %156 = arith.mulf %155, %11 : vector<8x16xf32>
    %157 = arith.addf %153, %156 : vector<8x16xf32>
    %c3_76 = arith.constant 3 : index
    %c0_77 = arith.constant 0 : index
    %158 = memref.load %arg7[%c3_76, %c0_77] : memref<4x4xf32, #tpu.memory_space<smem>>
    %159 = vector.broadcast %158 : f32 to vector<8x16xf32>
    %160 = arith.mulf %159, %9 : vector<8x16xf32>
    %161 = arith.addf %157, %160 : vector<8x16xf32>
    %c3_78 = arith.constant 3 : index
    %c1_79 = arith.constant 1 : index
    %162 = memref.load %arg6[%c3_78, %c1_79] : memref<4x4xf32, #tpu.memory_space<smem>>
    %163 = vector.broadcast %162 : f32 to vector<8x16xf32>
    %164 = arith.mulf %163, %17 : vector<8x16xf32>
    %165 = arith.addf %161, %164 : vector<8x16xf32>
    %c3_80 = arith.constant 3 : index
    %c1_81 = arith.constant 1 : index
    %166 = memref.load %arg7[%c3_80, %c1_81] : memref<4x4xf32, #tpu.memory_space<smem>>
    %167 = vector.broadcast %166 : f32 to vector<8x16xf32>
    %168 = arith.mulf %167, %15 : vector<8x16xf32>
    %169 = arith.addf %165, %168 : vector<8x16xf32>
    %c3_82 = arith.constant 3 : index
    %c2_83 = arith.constant 2 : index
    %170 = memref.load %arg6[%c3_82, %c2_83] : memref<4x4xf32, #tpu.memory_space<smem>>
    %171 = vector.broadcast %170 : f32 to vector<8x16xf32>
    %172 = arith.mulf %171, %23 : vector<8x16xf32>
    %173 = arith.addf %169, %172 : vector<8x16xf32>
    %c3_84 = arith.constant 3 : index
    %c2_85 = arith.constant 2 : index
    %174 = memref.load %arg7[%c3_84, %c2_85] : memref<4x4xf32, #tpu.memory_space<smem>>
    %175 = vector.broadcast %174 : f32 to vector<8x16xf32>
    %176 = arith.mulf %175, %21 : vector<8x16xf32>
    %177 = arith.addf %173, %176 : vector<8x16xf32>
    %c3_86 = arith.constant 3 : index
    %c3_87 = arith.constant 3 : index
    %178 = memref.load %arg6[%c3_86, %c3_87] : memref<4x4xf32, #tpu.memory_space<smem>>
    %179 = vector.broadcast %178 : f32 to vector<8x16xf32>
    %180 = arith.mulf %179, %29 : vector<8x16xf32>
    %181 = arith.addf %177, %180 : vector<8x16xf32>
    %c3_88 = arith.constant 3 : index
    %c3_89 = arith.constant 3 : index
    %182 = memref.load %arg7[%c3_88, %c3_89] : memref<4x4xf32, #tpu.memory_space<smem>>
    %183 = vector.broadcast %182 : f32 to vector<8x16xf32>
    %184 = arith.mulf %183, %27 : vector<8x16xf32>
    %185 = arith.addf %181, %184 : vector<8x16xf32>
    %c3_90 = arith.constant 3 : index
    %186 = memref.load %arg9[%c3_90] : memref<4xf32, #tpu.memory_space<smem>>
    %cst_91 = arith.constant 0.000000e+00 : f32
    %187 = vector.broadcast %cst_91 : f32 to vector<8x16xf32>
    %188 = arith.maximumf %185, %187 : vector<8x16xf32>
    %189 = vector.broadcast %186 : f32 to vector<8x16xf32>
    %190 = arith.mulf %189, %188 : vector<8x16xf32>
    %191 = arith.addf %151, %190 : vector<8x16xf32>
    %192 = arith.negf %191 : vector<8x16xf32>
    %193 = math.exp %192 : vector<8x16xf32>
    %cst_92 = arith.constant 1.000000e+00 : f32
    %194 = vector.broadcast %cst_92 : f32 to vector<8x16xf32>
    %195 = arith.addf %194, %193 : vector<8x16xf32>
    %196 = arith.divf %194, %195 : vector<8x16xf32>
    %c0_93 = arith.constant 0 : index
    %c0_94 = arith.constant 0 : index
    %c0_95 = arith.constant 0 : index
    %197 = vector.load %arg11[%c0_93, %c0_94, %c0_95] : memref<1x8x16xf32, #tpu.memory_space<vmem>>, vector<1x8x16xf32>
    %198 = vector.shape_cast %197 : vector<1x8x16xf32> to vector<8x16xf32>
    %199 = vector.shape_cast %196 : vector<8x16xf32> to vector<1x8x16xf32>
    tpu.vector_store %arg11[%c0_93, %c0_94, %c0_95], %199 {strides = array<i32>} : memref<1x8x16xf32, #tpu.memory_space<vmem>>, vector<1x8x16xf32>,
    return
  }
  func.func @transform_0(%arg0: i32, %arg1: i32) -> (i32, i32, i32, i32) {
    %c0_i32 = arith.constant 0 : i32
    %c0_i32_0 = arith.constant 0 : i32
    %c0_i32_1 = arith.constant 0 : i32
    return %arg0, %c0_i32, %arg1, %c0_i32_0 : i32, i32, i32, i32
  }
  func.func @transform_1(%arg0: i32, %arg1: i32) -> (i32, i32, i32, i32) {
    %c0_i32 = arith.constant 0 : i32
    %c0_i32_0 = arith.constant 0 : i32
    %c0_i32_1 = arith.constant 0 : i32
    %c0_i32_2 = arith.constant 0 : i32
    return %arg0, %c0_i32, %c0_i32_0, %c0_i32_1 : i32, i32, i32, i32
  }
  func.func @transform_2(%arg0: i32, %arg1: i32) -> (i32, i32) {
    %c0_i32 = arith.constant 0 : i32
    %c0_i32_0 = arith.constant 0 : i32
    return %arg1, %c0_i32 : i32, i32
  }
  func.func @transform_3(%arg0: i32, %arg1: i32) -> (i32, i32) {
    %c0_i32 = arith.constant 0 : i32
    %c0_i32_0 = arith.constant 0 : i32
    %c0_i32_1 = arith.constant 0 : i32
    return %c0_i32, %c0_i32_0 : i32, i32
  }
  func.func @transform_4(%arg0: i32, %arg1: i32) -> (i32, i32) {
    %c0_i32 = arith.constant 0 : i32
    %c0_i32_0 = arith.constant 0 : i32
    %c0_i32_1 = arith.constant 0 : i32
    return %c0_i32, %c0_i32_0 : i32, i32
  }
  func.func @transform_5(%arg0: i32, %arg1: i32) -> (i32, i32) {
    %c0_i32 = arith.constant 0 : i32
    %c0_i32_0 = arith.constant 0 : i32
    %c0_i32_1 = arith.constant 0 : i32
    return %c0_i32, %c0_i32_0 : i32, i32
  }
  func.func @transform_6(%arg0: i32, %arg1: i32) -> i32 {
    %c0_i32 = arith.constant 0 : i32
    %c0_i32_0 = arith.constant 0 : i32
    return %c0_i32 : i32
  }
  func.func @transform_7(%arg0: i32, %arg1: i32) -> i32 {
    %c0_i32 = arith.constant 0 : i32
    %c0_i32_0 = arith.constant 0 : i32
    return %c0_i32 : i32
  }
  func.func @transform_8(%arg0: i32, %arg1: i32) -> i32 {
    %c0_i32 = arith.constant 0 : i32
    %c0_i32_0 = arith.constant 0 : i32
    return %c0_i32 : i32
  }
  func.func @transform_9(%arg0: i32, %arg1: i32) -> (i32, i32, i32) {
    %c0_i32 = arith.constant 0 : i32
    %c0_i32_0 = arith.constant 0 : i32
    return %arg0, %arg1, %c0_i32 : i32, i32, i32
  }
}

</mosaic_0001>

<bundles_post_ra>
// kernel: tpu_custom_call.1
= control target key start
LH: loop header
LB: loop body
LE: loop exit
PB: predicated region body
PF: predicated region fallthrough
CT: control target
= control target key end

     0   :  { %s2463_s0 = inlined_call_operand.hbm [shape: f32[2,4,16,16], index: 0, kind: input, shape index: {}]   ;;  %s2464_s1 = inlined_call_operand.hbm [shape: f32[2,4,8,8], index: 1, kind: input, shape index: {}]   ;;  %s2465_s2 = inlined_call_operand.vmem [shape: f32[16,8], index: 2, kind: input, shape index: {}]   ;;  %s2466_s3 = inlined_call_operand.vmem [shape: f32[8,16], index: 3, kind: input, shape index: {}]   ;;  %s2467_s4 = inlined_call_operand.vmem [shape: f32[4,4], index: 4, kind: input, shape index: {}]   ;;  %s2468_s5 = inlined_call_operand.vmem [shape: f32[4,4], index: 5, kind: input, shape index: {}]   ;;  %s2469_s6 = inlined_call_operand.vmem [shape: f32[4], index: 6, kind: input, shape index: {}]   ;;  %s2470_s7 = inlined_call_operand.vmem [shape: f32[4], index: 7, kind: input, shape index: {}]   ;;  %s2471_s8 = inlined_call_operand.<no memory space> [shape: f32[1], index: 8, kind: input, shape index: {}]   ;;  %s2472_s9 = inlined_call_operand.hbm [shape: f32[2,16,16], index: 9, kind: output, shape index: {}]  }
   0x1   :  { %2489 = sst [smem:[#allocation35_spill]] %s2463_s0 }
   0x2   :  { %2490 = sst [smem:[#allocation36_spill]] %s2464_s1 }
   0x3   :  { %2491 = sst [smem:[#allocation37_spill]] %s2465_s2 }
   0x4   :  { %2492 = sst [smem:[#allocation38_spill]] %s2466_s3 }
   0x5   :  { %2493 = sst [smem:[#allocation39_spill]] %s2467_s4 }
   0x6   :  { %2494 = sst [smem:[#allocation40_spill]] %s2468_s5 }
   0x7   :  { %2495 = sst [smem:[#allocation41_spill]] %s2469_s6 }
   0x8   :  { %2496 = sst [smem:[#allocation42_spill]] %s2470_s7 }
   0x9   :  { %2497 = sst [smem:[#allocation43_spill]] %s2472_s9 }
   0xa   :  { %14 = sst [smem:[#allocation2]] %s2471_s8 }
   0xb   :  { %15 = vsyncpa [#allocation4], 0 }
   0xc   :  { %17 = vsyncpa [#allocation4 + $0x1], 0 }
   0xd   :  { %18 = vsyncpa [#allocation8], 0 }
   0xe   :  { %20 = vsyncpa [#allocation8 + $0x1], 0 }
   0xf   :  { %21 = vsyncpa [#allocation6], 0 }
  0x10   :  { %22 = vsyncpa [#allocation11], 0 }
  0x11   :  { %23 = vsyncpa [#allocation14], 0 }
  0x12   :  { %24 = vsyncpa [#allocation5], 0 }
  0x13   :  { %26 = vsyncpa [#allocation5 + $0x1], 0  ;;  %s2013_s11 = smov 0   ;;  %s2015_s12 = smov 0  }
  0x14   :  { %s2017_s13 = smov 0   ;;  %s2019_s14 = smov 0  }
  0x15   :  { %s2021_s15 = smov 0   ;;  %s2023_s8 = smov 0  }
  0x16   :  { %s2025_s16 = smov 0   ;;  %s2027_s17 = smov 0  }
  0x17   :  { %s2029_s18 = smov 0   ;;  %s2031_s19 = smov 0  }
  0x18   :  { %s2033_s20 = smov 0  }
  0x19 LB: > { %2498 = sst [smem:[#allocation22_spill]] %s1914_s13  ;;  %s1407_s21 = sadd.s32 4294967295, %s1946_s20   ;;  %s1946_s20 = sphi %s2033_s20, %s32_s20   ;;  %s1942_s19 = sphi %s2031_s19, %s2552_s19   ;;  %s1938_s18 = sphi %s2029_s18, %s2548_s18   ;;  %s1934_s17 = sphi %s2027_s17, %s2547_s17   ;;  %s1930_s16 = sphi %s2025_s16, %s2546_s16   ;;  %s1926_s8 = sphi %s2023_s8, %s2545_s8   ;;  %s1922_s15 = sphi %s2021_s15, %s2544_s15   ;;  %s1918_s14 = sphi %s2019_s14, %s2543_s14   ;;  %s1914_s13 = sphi %s2017_s13, %s2542_s13   ;;  %s1910_s12 = sphi %s2015_s12, %s2551_s12   ;;  %s1906_s11 = sphi %s2013_s11, %s2550_s11  }
  0x1a   : > { %2499 = sst [smem:[#allocation23_spill]] %s1918_s14  ;;  %s1408_s22 = sadd.s32 4294967294, %s1946_s20  }
  0x1b   : > { %2500 = sst [smem:[#allocation24_spill]] %s1922_s15  ;;  %p66_p0 = scmp.ne.s32.totalorder %s1922_s15, %s1918_s14 }
  0x1c   : > { %2501 = sst [smem:[#allocation25_spill]] %s1926_s8  ;;  %p2072_p1 = scmp.eq.s32.totalorder %s1407_s21, 0 }
  0x1d   : > { %2502 = sst [smem:[#allocation26_spill]] %s1934_s17  ;;  %p2076_p2 = scmp.eq.s32.totalorder %s1407_s21, 3 }
  0x1e   : > { %2503 = sst [smem:[#allocation27_spill]] %s1938_s18  ;;  %p276_p3 = scmp.eq.s32.totalorder %s1408_s22, 3 }
  0x1f   : > { %2504 = sst [smem:[#allocation28_spill]] %s1942_s19  ;;  %p2082_p4 = por %p2072_p1, %p66_p0 }
  0x20   : > { %s2505_s23 = scalar_select %p2072_p1, 1, 0 }
  0x21   : > { %s2506_s24 = scalar_select %p2076_p2, 1, 0 }
  0x22   : > { %s2507_s25 = scalar_select %p2082_p4, 1, 0 }
  0x23   : > { %p1409_p5 = scmp.ge.s32.totalorder %s1946_s20, 1  ;;  %p2087_p6 = por %p276_p3, %p66_p0 }
  0x24   : > { %p283_p7 = scmp.lt.s32.totalorder %s1946_s20, 5  ;;  %s2510_s5 = sld [smem:[#allocation40_spill]] }
  0x25   : > { %s2508_s26 = scalar_select %p2087_p6, 1, 0 }
  0x26   : > { %p2095_p8 = pnand %p1409_p5, %p283_p7  ;;  %s2513_s4 = sld [smem:[#allocation39_spill]] }
  0x27   : > { %2509 = sst [smem:[#allocation29_spill]] %s2508_s26 }
  0x28   : > { %s2511_s30 = scalar_select %p2095_p8, 1, 0 }
  0x29   : > { %p1559_p9 = pneg %p2095_p8 }
  0x2a   : > { %s310_s29 = sshll.u32 %s2510_s5, 4  ;;  %s311_s29 = int_to_ptr.vmem [resolvable:$true] %s310_s29 }
  0x2b   : > { %p2103_p10 = pnand %p1559_p9, %p2072_p1  ;;  %s1694_s28 = scalar_lea.vmem %s311_s29, 64 }
  0x2c   : > { %s299_s27 = sshll.u32 %s2513_s4, 4  ;;  %p1695_p11 = scmp.ne.s32.totalorder %s311_s29, %s1694_s28  ;;  %s300_s27 = int_to_ptr.vmem [resolvable:$true] %s299_s27 }
  0x2d   : > { %p1696_p12 = pneg %p2103_p10  ;;  %p1702_p3 = scmp.lt.s32.totalorder %s311_s29, %s311_s29 }
  0x2e   : > { %p1703_p5 = scmp.lt.s32.totalorder %s1694_s28, %s1694_s28 }
  0x2f   : > { %p1697_p13 = pnand %p1696_p12, %p1695_p11 }
  0x30   : > { %p1704_p7 = por %p1703_p5, %p1702_p3 }
  0x31   : > { %p1698_p0 = pneg %p1697_p13 }
  0x33   : > { %p1705_p9 = pnand %p1704_p7, %p1698_p0 }
  0x35   : > { %1708 = shalt.err (!%p1705_p9)
}
  0x36   : > { %s1948_s5 = smov [#allocation10]   ;;  %s1709_s21 = scalar_lea.vmem %s300_s27, 64 }
  0x37   : > { %1565 = dma.vmem_to_smem (!%p2103_p10), %s311_s29, 64, %s1948_s5, [#allocation11]  }
  0x38   : > { %p1710_p6 = scmp.ne.s32.totalorder %s300_s27, %s1709_s21  ;;  %p1717_p1 = scmp.lt.s32.totalorder %s300_s27, %s300_s27 }
  0x39   : > { %p1718_p2 = scmp.lt.s32.totalorder %s1709_s21, %s1709_s21 }
  0x3a   : > { %p1712_p4 = pnand %p1710_p6, %p1696_p12 }
  0x3b   : > { %p1719_p11 = por %p1718_p2, %p1717_p1 }
  0x3c   : > { %p1713_p8 = pneg %p1712_p4 }
  0x3e   : > { %p1720_p13 = pnand %p1719_p11, %p1713_p8 }
  0x40   : > { %1723 = shalt.err (!%p1720_p13)
}
  0x41   : > { %s1949_s22 = smov [#allocation9]   ;;  %s2514_s6 = sld [smem:[#allocation41_spill]] }
  0x42   : > { %1562 = dma.vmem_to_smem (!%p2103_p10), %s300_s27, 64, %s1949_s22, [#allocation6]  }
  0x43   : > { %s2515_s7 = sld [smem:[#allocation42_spill]] }
  0x47   : > { %s321_s5 = sshll.u32 %s2514_s6, 4  ;;  %s322_s5 = int_to_ptr.vmem [resolvable:$true] %s321_s5 }
  0x48   : > { %s1724_s9 = scalar_lea.vmem %s322_s5, 16  ;;  %p1732_p6 = scmp.lt.s32.totalorder %s322_s5, %s322_s5 }
  0x49   : > { %s332_s14 = sshll.u32 %s2515_s7, 4  ;;  %p1725_p4 = scmp.ne.s32.totalorder %s322_s5, %s1724_s9  ;;  %s333_s14 = int_to_ptr.vmem [resolvable:$true] %s332_s14 }
  0x4a   : > { %p1733_p8 = scmp.lt.s32.totalorder %s1724_s9, %s1724_s9 }
  0x4b   : > { %p1727_p1 = pnand %p1725_p4, %p1696_p12 }
  0x4c   : > { %p1734_p0 = por %p1733_p8, %p1732_p6 }
  0x4d   : > { %p1728_p2 = pneg %p1727_p1 }
  0x4f   : > { %p1735_p3 = pnand %p1734_p0, %p1728_p2 }
  0x51   : > { %1738 = shalt.err (!%p1735_p3)
}
  0x52   : > { %s1950_s27 = smov [#allocation12]   ;;  %s1739_s4 = scalar_lea.vmem %s333_s14, 16 }
  0x53   : > { %1568 = dma.vmem_to_smem (!%p2103_p10), %s322_s5, 16, %s1950_s27, [#allocation11]  }
  0x54   : > { %p1740_p5 = scmp.ne.s32.totalorder %s333_s14, %s1739_s4  ;;  %p1747_p11 = scmp.lt.s32.totalorder %s333_s14, %s333_s14 }
  0x55   : > { %p1748_p13 = scmp.lt.s32.totalorder %s1739_s4, %s1739_s4 }
  0x56   : > { %p1742_p7 = pnand %p1740_p5, %p1696_p12 }
  0x57   : > { %p1749_p4 = por %p1748_p13, %p1747_p11 }
  0x58   : > { %p1743_p9 = pneg %p1742_p7 }
  0x5a   : > { %p1750_p1 = pnand %p1749_p4, %p1743_p9 }
  0x5c   : > { %1753 = shalt.err (!%p1750_p1)
}
  0x5d   : > { %s1951_s9 = smov [#allocation13]   ;;  %s41_s26 = sadd.s32 1, %s1938_s18 }
  0x5e   : > { %1571 = dma.vmem_to_smem (!%p2103_p10), %s333_s14, 16, %s1951_s9, [#allocation14]  }
  0x5f   : > { %s44_s21 = sadd.s32 1, %s1942_s19  ;;  %p42_p12 = scmp.ge.s32.totalorder %s41_s26, 2 }
  0x60   : > { %s53_s22 = sadd.s32 1, %s1926_s8  ;;  %p60_p2 = scmp.ne.s32.totalorder %s1926_s8, %s1922_s15 }
  0x61   : > { %p61_p6 = scmp.eq.s32.totalorder %s1946_s20, 0  ;;  %s2554_s26 = smov (%p42_p12, %s41_s26), 0 }
  0x62   : > { %2516 = sst [smem:[#allocation30_spill]] %s2554_s26  ;;  %s2556_s21 = smov (!%p42_p12, %s44_s21), %s1942_s19 }
  0x63   : > { %s49_s10 = ssub.s32 %s1938_s18, %s2554_s26  ;;  %p2151_p8 = por %p61_p6, %p60_p2 }
  0x64   : > { %p46_p10 = scmp.ge.s32.totalorder %s2556_s21, 2  ;;  %p2518_p0 = scmp.ne.s32.totalorder %s2506_s24, 0 }
  0x65   : > { %p1587_p5 = scmp.lt.s32.totalorder %s1946_s20, 4  ;;  %s346_s5 = sand.u32 1, %s1926_s8  }
  0x66   : > { %p2157_p3 = por %p2518_p0, %p60_p2  ;;  %s2558_s21 = smov (%p46_p10, %s2556_s21), 0 }
  0x67   : > { %2521 = sst [smem:[#allocation32_spill]] %s2558_s21  ;;  %s1415_s29 = sshll.u32 %s346_s5, 5 }
  0x68   : > { %s2519_s14 = scalar_select %p2157_p3, 1, 0 }
  0x69   : > { %s2167_s27 = ssub.s32 %s1942_s19, %s2558_s21  ;;  %s1416_s24 = sshll.u32 %s1942_s19, 3 }
  0x6a   : > { %2520 = sst [smem:[#allocation31_spill]] %s2519_s14  ;;  %s50_s4 = sor.u32 %s49_s10, %s2167_s27 }
  0x6b   : > { %p77_p7 = scmp.eq.s32.totalorder %s2167_s27, 0  ;;  %p51_p9 = scmp.eq.s32.totalorder %s50_s4, 0 }
  0x6c   : > { %s355_s9 = sadd.s32 %s1938_s18, %s1416_s24  ;;  %s350_s6 = scalar_lea.vmem [#allocation3], %s1415_s29 }
  0x6d   : > { %s358_s7 = sshll.u32 %s350_s6, 4  ;;  %s1417_s14 = sshll.u32 %s355_s9, 7  ;;  %s359_s7 = int_to_ptr.vmem [resolvable:$true] %s358_s7 }
  0x6e   : > { %s2174_s26 = scalar_select %p51_p9, %s1926_s8, %s53_s22  }
  0x6f   : > { %s2523_s0 = sld [smem:[#allocation35_spill]]  ;;  %p2183_p11 = pnand %p1587_p5, %p2151_p8 }
  0x70   : > { %2522 = sst [smem:[#allocation33_spill]] %s2174_s26  ;;  %s347_s10 = scalar_lea.sflag [#allocation4], %s346_s5 }
  0x71   : > { %p1756_p13 = pneg %p2183_p11  ;;  %s1767_s29 = scalar_lea.vmem %s359_s7, 512 }
  0x72   : > { %p1768_p4 = scmp.ne.s32.totalorder %s359_s7, %s1767_s29  ;;  %s1952_s6 = smov [#allocation3]  }
  0x73   : > { %s1772_s22 = sshll.u32 %s1952_s6, 4  ;;  %s1773_s22 = int_to_ptr.vmem [resolvable:$false] %s1772_s22 }
  0x74   : > { %p1770_p1 = pnand %p1768_p4, %p1756_p13  ;;  %s1774_s4 = scalar_lea.vmem %s1773_s22, 1024 }
  0x75   : > { %s357_s3 = scalar_lea.hbm %s2523_s0, %s1417_s14  ;;  %p1775_p2 = scmp.lt.s32.totalorder %s359_s7, %s1773_s22 }
  0x76   : > { %p1771_p12 = pneg %p1770_p1  ;;  %p1776_p10 = scmp.lt.s32.totalorder %s1774_s4, %s1767_s29 }
  0x78   : > { %p1777_p0 = por %p1776_p10, %p1775_p2 }
  0x7a   : > { %p1778_p9 = pnand %p1777_p0, %p1771_p12 }
  0x7c   : > { %1781 = shalt.err (!%p1778_p9)
}
  0x7d   : > { %s1953_s2 = smov 256   ;;  %s1954_s17 = smov 128  }
  0x7e   : > { %s1955_s28 = smov 8   ;;  %s79_s14 = sadd.s32 1, %s1914_s13 }
  0x7f   : > { %1575 = dma.hbm_to_vmem [thread:$0]  (!%p2183_p11), %s357_s3, 512, %s359_s7, %s347_s10, %s1953_s2, %s1954_s17, %s1955_s28  }
  0x80   : > { %p86_p8 = scmp.ne.s32.totalorder %s1914_s13, %s1910_s12  ;;  %p92_p4 = scmp.ne.s32.totalorder %s1910_s12, %s1906_s11 }
  0x81   : > { %s2199_s5 = scalar_select %p77_p7, %s1914_s13, %s79_s14  }
  0x82   : > { %p88_p13 = por %p86_p8, %p61_p6  ;;  %s368_s24 = sand.u32 1, %s1914_s13  }
  0x83   : > { %2525 = sst [smem:[#allocation34_spill]] %s2199_s5  ;;  %s1480_s9 = sshll.u32 %s1942_s19, 9 }
  0x84   : > { %p2526_p1 = scmp.ne.s32.totalorder %s2505_s23, 0  ;;  %s1418_s6 = sshll.u32 %s368_s24, 5 }
  0x85   : > { %s2528_s1 = sld [smem:[#allocation36_spill]]  ;;  %p2218_p11 = pnand %p1587_p5, %p88_p13 }
  0x86   : > { %p2209_p12 = por %p92_p4, %p2526_p1  ;;  %s372_s27 = scalar_lea.vmem [#allocation7], %s1418_s6 }
  0x87   : > { %s379_s11 = sshll.u32 %s372_s27, 4  ;;  %s369_s10 = scalar_lea.sflag [#allocation8], %s368_s24  ;;  %s380_s11 = int_to_ptr.vmem [resolvable:$true] %s379_s11 }
  0x88   : > { %p1784_p6 = pneg %p2218_p11  ;;  %s1795_s4 = scalar_lea.vmem %s380_s11, 512 }
  0x89   : > { %p1796_p7 = scmp.ne.s32.totalorder %s380_s11, %s1795_s4  ;;  %s1956_s2 = smov [#allocation7]  }
  0x8a   : > { %s1800_s14 = sshll.u32 %s1956_s2, 4  ;;  %s1801_s14 = int_to_ptr.vmem [resolvable:$false] %s1800_s14 }
  0x8b   : > { %s378_s3 = scalar_lea.hbm %s2528_s1, %s1480_s9  ;;  %p1798_p2 = pnand %p1796_p7, %p1784_p6 }
  0x8c   : > { %s1802_s9 = scalar_lea.vmem %s1801_s14, 1024  ;;  %p1803_p0 = scmp.lt.s32.totalorder %s380_s11, %s1801_s14 }
  0x8d   : > { %p1799_p10 = pneg %p1798_p2  ;;  %p1804_p5 = scmp.lt.s32.totalorder %s1802_s9, %s1795_s4 }
  0x8f   : > { %p1805_p9 = por %p1804_p5, %p1803_p0 }
  0x91   : > { %p1806_p8 = pnand %p1805_p9, %p1799_p10 }
  0x93   : > { %1809 = shalt.err (!%p1806_p8)
}
  0x94   : > { %1578 = dma.hbm_to_vmem [thread:$0]  (!%p2218_p11), %s378_s3, 512, %s380_s11, %s369_s10, %s1954_s17, %s1954_s17, %s1955_s28  }
  0x95   : > { %p2530_p13 = scmp.ne.s32.totalorder %s2511_s30, 0 }
  0x96   : > { %s2232_s24 = sand.u32 (!%p2530_p13), 1, %s1922_s15   ;;  %p2531_p4 = scmp.ne.s32.totalorder (!%p2530_p13), %s2507_s25, 0 }
  0x97   : > { %398 = sbr.rel (%p2530_p13) target bundleno = 638 (0x27e), region = 56  ;;  %s1422_s6 = sshll.u32 (!%p2530_p13), %s2232_s24, 5 }
  0x98   : > { %s401_s21 = scalar_lea.sflag (!%p2530_p13), [#allocation4], %s2232_s24  ;;  %s2236_s22 = scalar_lea.vmem (!%p2530_p13), [#allocation3], %s1422_s6 }
  0x9c   : > { %1881 = dma.done.wait (%p2531_p4), %s401_s21, 512  }
  0x9d   : > { %1883 = vsyncadd (%p2531_p4), %s401_s21, 4294966784  ;;  %s409_s17 = sand.u32 1, %s1910_s12  }
  0x9e   : > { %s1423_s30 = sshll.u32 %s409_s17, 5  ;;  %s410_s28 = scalar_lea.sflag [#allocation8], %s409_s17 }
  0x9f   : > { %s2243_s3 = scalar_lea.vmem [#allocation7], %s1423_s30 }
  0xa0   : > { %1885 = dma.done.wait (%p2209_p12), %s410_s28, 512  }
  0xa1   : > { %1887 = vsyncadd (%p2209_p12), %s410_s28, 4294966784  ;;  %p2532_p1 = scmp.ne.s32.totalorder %s2505_s23, 0 }
  0xa3   : > { %1889 = dma.done.wait (%p2532_p1), [#allocation6], 64  }
  0xa4   : > { %1891 = vsyncadd (%p2532_p1), [#allocation6], 4294967232 }
  0xa5   : > { %1893 = dma.done.wait (%p2532_p1), [#allocation11], 80  }
  0xa6   : > { %1895 = vsyncadd (%p2532_p1), [#allocation11], 4294967216 }
  0xa7   : > { %1897 = dma.done.wait (%p2532_p1), [#allocation14], 16  }
  0xa8   : > { %1899 = vsyncadd (%p2532_p1), [#allocation14], 4294967280 }
  0xa9   : > { %434 = sfence }
  0xaa   : > { %v482_v0 = vld [vmem:[%s2243_s3] sm:$0xff]  ;;  %p474_p12 = scmp.lt.s32.totalorder %s1930_s16, 1  ;;  %v1957_v1 = vmov 0.0   ;;  %vm1958_vm0 = vmmov 0   ;;  %s2533_s7 = sld [smem:[#allocation38_spill]]  ;;  %vm488_vm1 = vcmask 64512  }
  0xab   : > { %1497 = vmatprep.subr.mxu0 %v1957_v1  ;;  %1499 = vmatprep.mubr.msk.f32.mxu0 %vm1958_vm0, %v1957_v1  ;;  %s2534_s4 = sld [smem:[#allocation37_spill]]  ;;  %v483_v3 = vld [vmem:[%s2243_s3 + $0x8] sm:$0xff]  ;;  %v484_v5 = vld [vmem:[%s2243_s3 + $0x10] sm:$0xff]  ;;  %v485_v6 = vld [vmem:[%s2243_s3 + $0x18] sm:$0xff]  ;;  %vm1228_vm2 = vcmask 130048  }
  0xac   : > { %1498 = vmatpush3.msra.mxu0 %v482_v0  ;;  %s475_s23 = scalar_select %p474_p12, %s1930_s16, 1  ;;  %1502 = vmatprep.subr.mxu1 %v1957_v1  ;;  %v478_v15 = vld [vmem:[%s2236_s22] sm:$0xff]  ;;  %v479_v29 = vld [vmem:[%s2236_s22 + $0x8] sm:$0xff]  ;;  %v480_v42 = vld [vmem:[%s2236_s22 + $0x10] sm:$0xff] }
  0xad   : > { %1507 = vmatprep.subr.mxu0 %v1957_v1  ;;  %1504 = vmatprep.mubr.msk.f32.mxu1 %vm1958_vm0, %v1957_v1  ;;  %s1068_s14 = sld [smem:[#allocation9]]  ;;  %v481_v55 = vld [vmem:[%s2236_s22 + $0x18] sm:$0xff] }
  0xae   : > { %s1429_s27 = sshll.u32 %s475_s23, 3  ;;  %s2289_s9 = sld [smem:[#allocation9 + $0x80]] }
  0xaf   : > { %s2291_s6 = sld [smem:[#allocation12]] }
  0xb0   : > { %v487_v2 = vld [vmem:[%s2533_s7] sm:$0xff]  ;;  %s2293_s21 = sld [smem:[#allocation10]] }
  0xb1   : > { %1503 = vmatpush3.msra.mxu1 %v487_v2  ;;  %s477_s2 = scalar_lea.vmem %s2534_s4, %s1429_s27  ;;  %s2295_s17 = sld [smem:[#allocation12 + $0x1]] }
  0xb2   : > { %1512 = vmatprep.subr.mxu1 %v1957_v1  ;;  %v486_v4 = vld [vmem:[%s477_s2] sm:$0xff]  ;;  %s2297_s30 = sld [smem:[#allocation10 + $0x80]] }
  0xb3   : > { %1500 = vmatmul.mubr.msk.f32.vlgmr.msra.gmra.mxu0 %vm488_vm1, %v486_v4  ;;  %s2299_s28 = sld [smem:[#allocation12 + $0x2]]  ;;  %v1069_v16 = vstv %s1068_s14 }
  0xb4   : > { %1508 = vmatpush3.msra.mxu0 %v483_v3  ;;  %1509 = vmatprep.mubr.msk.f32.mxu0 %vm1958_vm0, %v1957_v1  ;;  %s1455_s3 = sld [smem:[#allocation9 + $0x100]]  ;;  %v1108_v17 = vstv %s2289_s9  ;;  %v1070_v19 = vmul.f32 %v1069_v16, %v478_v15 }
  0xb5   : > { %1517 = vmatprep.subr.mxu0 %v1957_v1  ;;  %s2301_s25 = sld [smem:[#allocation10 + $0x100]]  ;;  %v1067_v21 = vstv %s2291_s6  ;;  %v1109_v22 = vmul.f32 %v1108_v17, %v478_v15 }
  0xb6   : > { %s2303_s29 = sld [smem:[#allocation12 + $0x3]]  ;;  %v1071_v27 = vadd.f32 %v1070_v19, %v1067_v21  ;;  %v1073_v31 = vstv %s2293_s21 }
  0xb7   : > { %1510 = vmatmul.mubr.msk.f32.vlgmr.msra.gmra.mxu0 %vm488_vm1, %v486_v4  ;;  %s1465_s7 = sld [smem:[#allocation9 + $0x180]]  ;;  %v1106_v23 = vstv %s2295_s17 }
  0xb8   : > { %1518 = vmatpush3.msra.mxu0 %v484_v5  ;;  %1519 = vmatprep.mubr.msk.f32.mxu0 %vm1958_vm0, %v1957_v1  ;;  %s2305_s23 = sld [smem:[#allocation10 + $0x180]]  ;;  %v1110_v32 = vadd.f32 %v1109_v22, %v1106_v23  ;;  %v1112_v33 = vstv %s2297_s30  ;;  %s1428_s30 = sshll.u32 %s2232_s24, 3 }
  0xb9   : > { %1527 = vmatprep.subr.mxu0 %v1957_v1  ;;  %s2307_s27 = sld [smem:[#allocation9 + $0x1]]  ;;  %v1145_v25 = vstv %s2299_s28 }
  0xba   : > { %s2309_s11 = sld [smem:[#allocation10 + $0x1]]  ;;  %v1147_v18 = vstv %s1455_s3 }
  0xbb   : > { %1520 = vmatmul.mubr.msk.f32.vlgmr.msra.gmra.mxu0 %vm488_vm1, %v486_v4  ;;  %s2311_s10 = sld [smem:[#allocation9 + $0x81]]  ;;  %v1148_v24 = vmul.f32 %v1147_v18, %v478_v15  ;;  %v1151_v36 = vstv %s2301_s25 }
  0xbc   : > { %1528 = vmatpush3.msra.mxu0 %v485_v6  ;;  %1529 = vmatprep.mubr.msk.f32.mxu0 %vm1958_vm0, %v1957_v1  ;;  %s2313_s4 = sld [smem:[#allocation10 + $0x81]]  ;;  %v1184_v28 = vstv %s2303_s29 }
  0xbd   : > { %s2315_s2 = sld [smem:[#allocation9 + $0x101]]  ;;  %v1186_v20 = vstv %s1465_s7  ;;  %v1149_v35 = vadd.f32 %v1148_v24, %v1145_v25 }
  0xbe   : > { %s2317_s0 = sld [smem:[#allocation10 + $0x101]]  ;;  %v1187_v26 = vmul.f32 %v1186_v20, %v478_v15  ;;  %v1190_v40 = vstv %s2305_s23  ;;  %s473_s23 = scalar_lea.vmem [#allocation15], %s1428_s30 }
  0xbf   : > { %1530 = vmatmul.mubr.msk.f32.vlgmr.msra.gmra.mxu0 %vm488_vm1, %v486_v4  ;;  %s2319_s1 = sld [smem:[#allocation9 + $0x181]]  ;;  %v1077_v30 = vstv %s2307_s27  ;;  %s1246_s27 = sshll.u32 %s473_s23, 4  ;;  %s1247_s27 = int_to_ptr.vmem [resolvable:$true] %s1246_s27 }
  0xc0   : > { %s2321_s19 = sld [smem:[#allocation10 + $0x181]]  ;;  %v1188_v39 = vadd.f32 %v1187_v26, %v1184_v28  ;;  %v1078_v41 = vmul.f32 %v1077_v30, %v479_v29  ;;  %v1081_v44 = vstv %s2309_s11 }
  0xc1   : > { %s2323_s18 = sld [smem:[#allocation9 + $0x2]]  ;;  %v1116_v34 = vstv %s2311_s10 }
  0xc2   : > { %s2325_s26 = sld [smem:[#allocation10 + $0x2]]  ;;  %v1117_v45 = vmul.f32 %v1116_v34, %v479_v29  ;;  %v1120_v48 = vstv %s2313_s4 }
  0xc3   : > { %s2328_s8 = sld [smem:[#allocation9 + $0x82]]  ;;  %v1155_v37 = vstv %s2315_s2 }
  0xc4   : > { %s2331_s15 = sld [smem:[#allocation10 + $0x82]]  ;;  %v1156_v49 = vmul.f32 %v1155_v37, %v479_v29  ;;  %v1159_v50 = vstv %s2317_s0 }
  0xc5   : > { %s2333_s5 = sld [smem:[#allocation9 + $0x102]]  ;;  %v1194_v38 = vstv %s2319_s1 }
  0xc6   : > { %s2335_s13 = sld [smem:[#allocation10 + $0x102]]  ;;  %v1195_v51 = vmul.f32 %v1194_v38, %v479_v29  ;;  %v1198_v52 = vstv %s2321_s19 }
  0xc7   : > { %s2338_s14 = sld [smem:[#allocation9 + $0x182]]  ;;  %v1085_v43 = vstv %s2323_s18 }
  0xc8   : > { %s2341_s9 = sld [smem:[#allocation9 + $0x3]]  ;;  %v1086_v53 = vmul.f32 %v1085_v43, %v480_v42  ;;  %v1089_v58 = vstv %s2325_s26 }
  0xc9   : > { %s2344_s3 = sld [smem:[#allocation10 + $0x182]]  ;;  %v1124_v46 = vstv %s2328_s8 }
  0xca   : > { %s2349_s6 = sld [smem:[#allocation10 + $0x3]]  ;;  %v1125_v59 = vmul.f32 %v1124_v46, %v480_v42  ;;  %v1128_v60 = vstv %s2331_s15 }
  0xcb   : > { %s2354_s17 = sld [smem:[#allocation9 + $0x83]]  ;;  %v1163_v47 = vstv %s2333_s5 }
  0xcc   : > { %s2359_s28 = sld [smem:[#allocation9 + $0x103]]  ;;  %v1164_v61 = vmul.f32 %v1163_v47, %v480_v42  ;;  %v1167_v3 = vstv %s2335_s13 }
  0xcd   : > { %s2364_s21 = sld [smem:[#allocation9 + $0x183]]  ;;  %v1202_v54 = vstv %s2338_s14  ;;  %s1231_s14 = scalar_lea.sflag [#allocation5], %s2232_s24 }
  0xce   : > { %v1093_v56 = vstv %s2341_s9  ;;  %s2375_s1 = sld [smem:[#allocation10 + $0x83]]  ;;  %v1203_v4 = vmul.f32 %v1202_v54, %v480_v42  ;;  %s1810_s9 = scalar_lea.vmem %s1247_s27, 128 }
  0xcf   : > { %v1206_v5 = vstv %s2344_s3  ;;  %v1094_v6 = vmul.f32 %v1093_v56, %v481_v55  ;;  %s2381_s0 = sld [smem:[#allocation10 + $0x103]]  ;;  %p1811_p11 = scmp.ne.s32.totalorder %s1247_s27, %s1810_s9 }
  0xd0   : > { %s2383_s15 = sld [smem:[#allocation10 + $0x183]]  ;;  %s1959_s3 = smov [#allocation15]  }
  0xd1   : > { %s2390_s13 = sld [smem:[#allocation13]]  ;;  %p1812_p6 = pnand %p1811_p11, %p2157_p3 }
  0xd2   : > { %s2392_s8 = sld [smem:[#allocation2]] }
  0xd3   : > { %v1210_v15 = vstv %s2364_s21  ;;  %s2394_s18 = sld [smem:[#allocation13 + $0x1]]  ;;  %p1813_p7 = pneg %p1812_p6 }
  0xd4   : > { %v1136_v28 = vstv %s2375_s1  ;;  %s1463_s19 = sld [smem:[#allocation13 + $0x2]] }
  0xd5   : > { %s1473_s26 = sld [smem:[#allocation13 + $0x3]] }
  0xd6   : > { %v1214_v46 = vstv %s2383_s15  ;;  %s2535_s5 = sld [smem:[#allocation26_spill]] }
  0xd7   : > { %s2537_s4 = sld [smem:[#allocation43_spill]] }
  0xdc   : > { %s1476_s25 = sshll.u32 %s2535_s5, 1 }
  0xdd   : > { %s1242_s29 = sadd.s32 %s1930_s16, %s1476_s25  ;;  %s1814_s16 = sshll.u32 %s1959_s3, 4  ;;  %s1815_s16 = int_to_ptr.vmem [resolvable:$false] %s1814_s16 }
  0xde   : > { %s1477_s7 = sshll.u32 %s1242_s29, 7  ;;  %p1817_p2 = scmp.lt.s32.totalorder %s1247_s27, %s1815_s16 }
  0xdf   : > { %s2407_s2 = scalar_lea.hbm %s2537_s4, %s1477_s7 }
 0x173   : > { %v558_v7 = vpop.f32.mrf.mxu0 }
 0x174   : > { %1505 = vmatmul.mubr.msk.f32.vlgmr.msra.gmra.mxu1 %vm488_vm1, %v558_v7 }
 0x175   : > { %1513 = vmatpush3.msra.mxu1 %v487_v2  ;;  %v1501_v8 = vpop.f32.mrf.mxu0  ;;  %1514 = vmatprep.mubr.msk.f32.mxu1 %vm1958_vm0, %v1957_v1 }
 0x176   : > { %1522 = vmatprep.subr.mxu1 %v1957_v1 }
 0x177   : > { %v701_v9 = vpop.f32.mrf.mxu0 }
 0x178   : > { %1515 = vmatmul.mubr.msk.f32.vlgmr.msra.gmra.mxu1 %vm488_vm1, %v701_v9 }
 0x179   : > { %1523 = vmatpush3.msra.mxu1 %v487_v2  ;;  %v1511_v10 = vpop.f32.mrf.mxu0  ;;  %1524 = vmatprep.mubr.msk.f32.mxu1 %vm1958_vm0, %v1957_v1 }
 0x17a   : > { %1532 = vmatprep.subr.mxu1 %v1957_v1 }
 0x17b   : > { %v844_v11 = vpop.f32.mrf.mxu0 }
 0x17c   : > { %1525 = vmatmul.mubr.msk.f32.vlgmr.msra.gmra.mxu1 %vm488_vm1, %v844_v11 }
 0x17d   : > { %1533 = vmatpush3.msra.mxu1 %v487_v2  ;;  %v1521_v12 = vpop.f32.mrf.mxu0  ;;  %1534 = vmatprep.mubr.msk.f32.mxu1 %vm1958_vm0, %v1957_v1 }
 0x17e   : > { %v1097_v12 = vstv %s2349_s6  ;;  %s1816_s6 = scalar_lea.vmem %s1815_s16, 256 }
 0x17f   : > { %v987_v13 = vpop.f32.mrf.mxu0  ;;  %p1818_p10 = scmp.lt.s32.totalorder %s1816_s6, %s1810_s9 }
 0x180   : > { %1535 = vmatmul.mubr.msk.f32.vlgmr.msra.gmra.mxu1 %vm488_vm1, %v987_v13  ;;  %v1132_v13 = vstv %s2354_s17 }
 0x181   : > { %v1531_v14 = vpop.f32.mrf.mxu0  ;;  %p1819_p0 = por %p1818_p10, %p1817_p2 }
 0x182   : > { %v1171_v14 = vstv %s2359_s28 }
 0x183   : > { %p1820_p5 = pnand %p1819_p0, %p1813_p7 }
 0x234   : > { %v631_v57 = vpop.f32.mrf.mxu1 }
 0x235   : > { %v1074_v62 = vmul.f32 %v1073_v31, %v631_v57  ;;  %v1113_v63 = vmul.f32 %v1112_v33, %v631_v57  ;;  %v1152_v0 = vmul.f32 %v1151_v36, %v631_v57  ;;  %v1191_v1 = vmul.f32 %v1190_v40, %v631_v57 }
 0x236   : > { %v1506_v2 = vpop.f32.mrf.mxu1  ;;  %v1211_v33 = vmul.f32 %v1210_v15, %v481_v55 }
 0x237   : > { %v1075_v7 = vadd.f32 %v1074_v62, %v1071_v27  ;;  %v1114_v8 = vadd.f32 %v1113_v63, %v1110_v32  ;;  %v1153_v9 = vadd.f32 %v1152_v0, %v1149_v35  ;;  %v1192_v10 = vadd.f32 %v1191_v1, %v1188_v39 }
 0x238   : > { %v774_v11 = vpop.f32.mrf.mxu1  ;;  %v1133_v27 = vmul.f32 %v1132_v13, %v481_v55  ;;  %v1172_v32 = vmul.f32 %v1171_v14, %v481_v55  ;;  %v1065_v2 = vstv %s2392_s8 }
 0x239   : > { %v1079_v16 = vadd.f32 %v1078_v41, %v1075_v7  ;;  %v1082_v17 = vmul.f32 %v1081_v44, %v774_v11  ;;  %v1118_v18 = vadd.f32 %v1117_v45, %v1114_v8  ;;  %v1121_v19 = vmul.f32 %v1120_v48, %v774_v11 }
 0x23a   : > { %v1157_v20 = vadd.f32 %v1156_v49, %v1153_v9  ;;  %v1160_v21 = vmul.f32 %v1159_v50, %v774_v11  ;;  %v1196_v22 = vadd.f32 %v1195_v51, %v1192_v10  ;;  %v1199_v23 = vmul.f32 %v1198_v52, %v774_v11  ;;  %v1516_v24 = vpop.f32.mrf.mxu1 }
 0x23b   : > { %v1083_v25 = vadd.f32 %v1082_v17, %v1079_v16  ;;  %v1122_v26 = vadd.f32 %v1121_v19, %v1118_v18  ;;  %v1175_v45 = vstv %s2381_s0  ;;  %v1219_v10 = vstv %s1473_s26 }
 0x23c   : > { %v1161_v29 = vadd.f32 %v1160_v21, %v1157_v20  ;;  %v1200_v30 = vadd.f32 %v1199_v23, %v1196_v22  ;;  %v917_v31 = vpop.f32.mrf.mxu1 }
 0x23d   : > { %v1087_v34 = vadd.f32 %v1086_v53, %v1083_v25  ;;  %v1090_v35 = vmul.f32 %v1089_v58, %v917_v31  ;;  %v1126_v36 = vadd.f32 %v1125_v59, %v1122_v26  ;;  %v1129_v37 = vmul.f32 %v1128_v60, %v917_v31 }
 0x23e   : > { %v1165_v38 = vadd.f32 %v1164_v61, %v1161_v29  ;;  %v1168_v39 = vmul.f32 %v1167_v3, %v917_v31  ;;  %v1204_v40 = vadd.f32 %v1203_v4, %v1200_v30  ;;  %v1207_v41 = vmul.f32 %v1206_v5, %v917_v31  ;;  %v1526_v42 = vpop.f32.mrf.mxu1 }
 0x23f   : > { %v1091_v43 = vadd.f32 %v1090_v35, %v1087_v34  ;;  %v1130_v44 = vadd.f32 %v1129_v37, %v1126_v36  ;;  %v1102_v61 = vstv %s2390_s13  ;;  %v1141_v3 = vstv %s2394_s18 }
 0x240   : > { %v1169_v47 = vadd.f32 %v1168_v39, %v1165_v38  ;;  %v1208_v48 = vadd.f32 %v1207_v41, %v1204_v40  ;;  %v1060_v49 = vpop.f32.mrf.mxu1 }
 0x241   : > { %v1095_v50 = vadd.f32 %v1094_v6, %v1091_v43  ;;  %v1098_v51 = vmul.f32 %v1097_v12, %v1060_v49  ;;  %v1134_v52 = vadd.f32 %v1133_v27, %v1130_v44  ;;  %v1137_v53 = vmul.f32 %v1136_v28, %v1060_v49 }
 0x242   : > { %v1173_v54 = vadd.f32 %v1172_v32, %v1169_v47  ;;  %v1176_v55 = vmul.f32 %v1175_v45, %v1060_v49  ;;  %v1212_v56 = vadd.f32 %v1211_v33, %v1208_v48  ;;  %v1215_v57 = vmul.f32 %v1214_v46, %v1060_v49  ;;  %v1536_v58 = vpop.f32.mrf.mxu1 }
 0x243   : > { %v1099_v59 = vadd.f32 %v1098_v51, %v1095_v50  ;;  %v1138_v60 = vadd.f32 %v1137_v53, %v1134_v52  ;;  %v1180_v6 = vstv %s1463_s19 }
 0x244   : > { %v1177_v62 = vadd.f32 %v1176_v55, %v1173_v54  ;;  %v1216_v1 = vadd.f32 %v1215_v57, %v1212_v56 }
 0x245   : > { %v1101_v63 = vmax.f32 %v1099_v59, 0.0  ;;  %v1140_v0 = vmax.f32 %v1138_v60, 0.0 }
 0x246   : > { %v1179_v5 = vmax.f32 %v1177_v62, 0.0  ;;  %v1218_v9 = vmax.f32 %v1216_v1, 0.0 }
 0x247   : > { %v1103_v4 = vmul.f32 %v1102_v61, %v1101_v63  ;;  %v1142_v8 = vmul.f32 %v1141_v3, %v1140_v0 }
 0x248   : > { %v1181_v12 = vmul.f32 %v1180_v6, %v1179_v5  ;;  %v1220_v14 = vmul.f32 %v1219_v10, %v1218_v9 }
 0x249   : > { %v1104_v7 = vadd.f32 %v1103_v4, %v1065_v2 }
 0x24b   : > { %v1143_v11 = vadd.f32 %v1142_v8, %v1104_v7 }
 0x24d   : > { %v1182_v13 = vadd.f32 %v1181_v12, %v1143_v11 }
 0x24f   : > { %v1221_v15 = vadd.f32 %v1220_v14, %v1182_v13 }
 0x251   : > { %v1474_v16 = vmul.f32 -1.442695, %v1221_v15 }
 0x253   : > { %1690 = vpow2.f32 %v1474_v16 }
 0x260   : > { %v1691_v17 = vpop.eup %1690 }
 0x261   : > { %v1225_v18 = vadd.f32 1.0, %v1691_v17 }
 0x263   : > { %1692 = vrcp.f32 %v1225_v18 }
 0x270   : > { %v1693_v19 = vpop.eup %1692 }
 0x271   : > { %1229 = vst.msk [vmem:[%s473_s23] sm:$0xff] %vm1228_vm2, %v1693_v19 }
 0x272   : > { %1823 = shalt.err (!%p1820_p5)
}
 0x273   : > { %s1824_s17 = scalar_lea.hbm %s2407_s2, 128  ;;  %s1828_s21 = scalar_lea.hbm %s2537_s4, 512 }
 0x274   : > { %p1825_p9 = scmp.ne.s32.totalorder %s2407_s2, %s1824_s17  ;;  %p1829_p4 = scmp.lt.s32.totalorder %s2407_s2, %s2537_s4 }
 0x275   : > { %p1830_p1 = scmp.lt.s32.totalorder %s1828_s21, %s1824_s17 }
 0x276   : > { %p1826_p8 = pnand %p1825_p9, %p2157_p3 }
 0x277   : > { %p1831_p12 = por %p1830_p1, %p1829_p4 }
 0x278   : > { %p1827_p13 = pneg %p1826_p8 }
 0x27a   : > { %p1832_p11 = pnand %p1831_p12, %p1827_p13 }
 0x27c   : > { %1835 = shalt.err (!%p1832_p11)
}
 0x27d   : > { %1557 = dma.vmem_to_hbm [thread:$0]  (%p2157_p3), %s1247_s27, 128, %s2407_s2, %s1231_s14  }
 0x27e PF: > { %s2538_s15 = sld [smem:[#allocation23_spill]]  ;;  %p1592_p6 = scmp.ge.s32.totalorder %s1946_s20, 2 }
 0x27f   : > { %s2539_s13 = sld [smem:[#allocation29_spill]] }
 0x284   : > { %s1258_s8 = sand.u32 1, %s2538_s15  }
 0x285   : > { %p2540_p7 = scmp.ne.s32.totalorder %s2539_s13, 0  ;;  %s1259_s18 = scalar_lea.sflag [#allocation5], %s1258_s8 }
 0x287   : > { %p1580_p2 = pnand %p1592_p6, %p2540_p7 }
 0x289   : > { %p1581_p10 = pneg %p1580_p2 }
 0x28b   : > { %1901 = dma.done.wait (%p1581_p10), %s1259_s18, 128  }
 0x28c   : > { %1903 = vsyncadd (%p1581_p10), %s1259_s18, 4294967168  ;;  %s32_s20 = sadd.s32 1, %s1946_s20   ;;  %s2541_s19 = sld [smem:[#allocation22_spill]] }
 0x28d   : > { %p29_p0 = scmp.ge.s32.totalorder %s32_s20, 6   ;;  %s2542_s13 = sld [smem:[#allocation34_spill]] }
 0x28e   : > { %s2543_s14 = sld [smem:[#allocation24_spill]]  ;;  %s2550_s11 = smov %s1910_s12 }
 0x28f   : > { %s2544_s15 = sld [smem:[#allocation25_spill]] }
 0x290   : > { %s2545_s8 = sld [smem:[#allocation33_spill]] }
 0x291   : > { %s2546_s16 = sld [smem:[#allocation27_spill]] }
 0x292   : > { %s2547_s17 = sld [smem:[#allocation28_spill]]  ;;  %s2551_s12 = smov %s2541_s19 }
 0x293   : > { %s2548_s18 = sld [smem:[#allocation30_spill]] }
 0x294   : > { %s2549_s26 = sld [smem:[#allocation32_spill]] }
 0x296   :  { %31 = sbr.rel (!%p29_p0) target bundleno = 25 (0x19), region = 134 }
 0x29a   : > { %s2552_s19 = smov %s2549_s26 }
 0x29b   :  { %1264 = vsyncpa [#allocation4], 1 }
 0x29c   :  { %1266 = vsyncpa [#allocation4 + $0x1], 1 }
 0x29d   :  { %1267 = vsyncpa [#allocation8], 1 }
 0x29e   :  { %1269 = vsyncpa [#allocation8 + $0x1], 1 }
 0x29f   :  { %1270 = vsyncpa [#allocation5], 1 }
 0x2a0   :  { %1272 = vsyncpa [#allocation5 + $0x1], 1 }
 0x2a1   :  { %1273 = vsyncpa [#allocation6], 1 }
 0x2a2   :  { %1275 = vsyncpa [#allocation6 + $0x1], 1 }
 0x2a3   :  { %1276 = vsyncpa [#allocation11], 1 }
 0x2a4   :  { %1277 = vsyncpa [#allocation14], 1 }

</bundles_post_ra>
